<compile_context>
chip_gen: v5e
topology: v5e:2x2
jax: 0.10.0
libtpu: 0.0.40
codegen_flags: <defaults>
</compile_context>

<pallas_src>
import math

import jax
import jax.numpy as jnp
from jax.experimental import pallas as pl
from jax.experimental.pallas import tpu as pltpu


# ----------------------------------------------------------------------------
# In-kernel math helpers (f32 VPU/EUP only)
# ----------------------------------------------------------------------------
def _erf(z):
    # Abramowitz & Stegun 7.1.26 (max abs error 1.5e-7).  exp and the
    # approximate reciprocal run on the EUP slot (free next to VPU poly math).
    p = 0.3275911
    a1, a2, a3, a4, a5 = (0.254829592, -0.284496736, 1.421413741,
                          -1.453152027, 1.061405429)
    s = jnp.where(z < 0.0, -1.0, 1.0)
    az = jnp.abs(z)
    t = pl.reciprocal(1.0 + p * az, approx=True)
    poly = ((((a5 * t + a4) * t + a3) * t + a2) * t + a1) * t
    return s * (1.0 - poly * jnp.exp(-az * az))


def _gelu_exact(x):
    # PyTorch nn.GELU() default (erf-based) GELU, evaluated in f32.
    return 0.5 * x * (1.0 + _erf(x * (1.0 / math.sqrt(2.0))))


# ----------------------------------------------------------------------------
# Fused FeedForward kernel: y = GELU(x @ W1 + b1) @ W2 + b2
#   grid = (row_tiles [parallel], hidden_tiles [arbitrary / reduction])
# ----------------------------------------------------------------------------
def _ffn_kernel(x_ref, w1_ref, b1_ref, w2_ref, b2_ref, o_ref, acc_ref):
    h_idx = pl.program_id(1)

    @pl.when(h_idx == 0)
    def _init():
        acc_ref[...] = jnp.zeros_like(acc_ref)

    # MXU operands in the (low-precision) weight dtype, f32 accumulation.
    x = x_ref[...].astype(w1_ref.dtype)                          # (TM, D)
    h = jnp.dot(x, w1_ref[...], preferred_element_type=jnp.float32)
    h = h + b1_ref[...]                                          # (1, tH) f32
    h = _gelu_exact(h)                                           # f32 GELU
    acc_ref[...] += jnp.dot(h.astype(w2_ref.dtype), w2_ref[...],
                            preferred_element_type=jnp.float32)  # (TM, D) f32

    @pl.when(h_idx == pl.num_programs(1) - 1)
    def _finalize():
        o_ref[...] = (acc_ref[...] + b2_ref[...]).astype(o_ref.dtype)


# ----------------------------------------------------------------------------
# Wrapper
# ----------------------------------------------------------------------------
def _pick_hidden_tile(hidden, max_tile):
    """Largest hidden tile <= max_tile that exactly divides H (so the hidden
    reduction never accumulates padded-garbage columns)."""
    if hidden <= max_tile:
        return hidden
    start = max_tile - (max_tile % 128)
    for cand in range(start, 127, -128):
        if hidden % cand == 0:
            return cand
    return hidden  # fall back to full H resident


def feed_forward(x, w1, b1, w2, b2, *, block_rows=256, hidden_block=512,
                 use_bf16=True):
    """Fused Linear -> GELU -> Linear (Dropout p=0 is identity).

    x : (..., D) float32
    w1: (D, H), b1: (H,)   -- first Linear, stored as (in, out)
    w2: (H, D), b2: (D,)   -- second Linear, stored as (in, out)
    """
    orig_shape = x.shape
    D = orig_shape[-1]
    H = w1.shape[1]

    x2 = x.reshape(-1, D)
    M = x2.shape[0]

    tm = M if M <= block_rows else block_rows
    n_rows = pl.cdiv(M, tm)          # no host-side pad; tail block is masked
    tH = _pick_hidden_tile(H, hidden_block)
    n_h = H // tH

    w_dtype = jnp.bfloat16 if use_bf16 else x2.dtype
    w1c = w1.astype(w_dtype)
    w2c = w2.astype(w_dtype)
    b1r = b1.reshape(1, H).astype(jnp.float32)
    b2r = b2.reshape(1, D).astype(jnp.float32)

    flops = 4 * M * D * H                       # two matmuls
    bytes_accessed = (x2.size * x2.dtype.itemsize
                      + w1c.size * w1c.dtype.itemsize
                      + w2c.size * w2c.dtype.itemsize
                      + b1r.size * 4 + b2r.size * 4
                      + M * D * x2.dtype.itemsize)

    # TODO(synk): if D is not a multiple of 128 at realistic model sizes, pad
    # the feature dim in the wrapper for lane-dense (unmasked) output stores.
    out = pl.pallas_call(
        _ffn_kernel,
        out_shape=jax.ShapeDtypeStruct((M, D), x.dtype),
        grid=(n_rows, n_h),
        in_specs=[
            pl.BlockSpec((tm, D), lambda i, h: (i, 0)),    # activations
            pl.BlockSpec((D, tH), lambda i, h: (0, h)),    # W1 hidden tile
            pl.BlockSpec((1, tH), lambda i, h: (0, h)),    # b1 hidden tile
            pl.BlockSpec((tH, D), lambda i, h: (h, 0)),    # W2 hidden tile
            pl.BlockSpec((1, D), lambda i, h: (0, 0)),     # b2 (tiny, resident)
        ],
        out_specs=pl.BlockSpec((tm, D), lambda i, h: (i, 0)),
        scratch_shapes=[pltpu.VMEM((tm, D), jnp.float32)],  # f32 accumulator
        compiler_params=pltpu.CompilerParams(
            dimension_semantics=("parallel", "arbitrary"),
            vmem_limit_bytes=64 * 1024 * 1024),
        cost_estimate=pl.CostEstimate(flops=flops,
                                      transcendentals=2 * M * H,
                                      bytes_accessed=bytes_accessed),
    )(x2, w1c, b1r, w2c, b2r)

    return out.reshape(orig_shape)


# ----------------------------------------------------------------------------
# Parameter init matching PyTorch nn.Linear defaults
# ----------------------------------------------------------------------------
def init_feed_forward_params(key, dim, hidden_dim):
    # nn.Linear default: W, b ~ U(-1/sqrt(fan_in), +1/sqrt(fan_in))
    k1, k2, k3, k4 = jax.random.split(key, 4)
    bound1 = 1.0 / math.sqrt(dim)
    w1_pt = jax.random.uniform(k1, (hidden_dim, dim), jnp.float32,
                               -bound1, bound1)          # (out, in)
    b1 = jax.random.uniform(k2, (hidden_dim,), jnp.float32, -bound1, bound1)
    bound2 = 1.0 / math.sqrt(hidden_dim)
    w2_pt = jax.random.uniform(k3, (dim, hidden_dim), jnp.float32,
                               -bound2, bound2)          # (out, in)
    b2 = jax.random.uniform(k4, (dim,), jnp.float32, -bound2, bound2)
    # Store transposed (in, out) so the kernel computes x @ W directly.
    return {"w1": w1_pt.T, "b1": b1, "w2": w2_pt.T, "b2": b2}


@jax.jit
def feed_forward_jit(params, x):
    return feed_forward(x, params["w1"], params["b1"],
                        params["w2"], params["b2"])


# ----------------------------------------------------------------------------
if __name__ == "__main__":
    B, S, DIM, HIDDEN = 2, 8, 64, 128

    key = jax.random.PRNGKey(0)
    k_params, k_x = jax.random.split(key)

    params = init_feed_forward_params(k_params, DIM, HIDDEN)
    x = jax.random.normal(k_x, (B, S, DIM), jnp.float32)

    out = feed_forward_jit(params, x)
    jax.block_until_ready(out)

    # Pure-JAX reference mirroring the kernel's numerics
    # (bf16 MXU operands, f32 accumulation, exact erf GELU in f32).
    x2 = x.reshape(-1, DIM)
    h = jnp.dot(x2.astype(jnp.bfloat16), params["w1"].astype(jnp.bfloat16),
                preferred_element_type=jnp.float32) + params["b1"]
    h = jax.nn.gelu(h, approximate=False)
    y = jnp.dot(h.astype(jnp.bfloat16), params["w2"].astype(jnp.bfloat16),
                preferred_element_type=jnp.float32) + params["b2"]
    ref = y.reshape(B, S, DIM)

    assert out.shape == (B, S, DIM) and out.dtype == jnp.float32
    max_err = float(jnp.max(jnp.abs(out - ref)))
    assert max_err < 5e-3, f"mismatch vs reference: {max_err}"
    print("KERNEL_OK")
</pallas_src>

<mosaic_0001>
module attributes {stable_mosaic.version = 11 : i64} {
  func.func @_ffn_kernel(%arg0: i32, %arg1: i32, %arg2: memref<16x64xf32, #tpu.memory_space<vmem>>, %arg3: memref<64x128xbf16, #tpu.memory_space<vmem>>, %arg4: memref<1x128xf32, #tpu.memory_space<vmem>>, %arg5: memref<128x64xbf16, #tpu.memory_space<vmem>>, %arg6: memref<1x64xf32, #tpu.memory_space<vmem>>, %arg7: memref<16x64xf32, #tpu.memory_space<vmem>>, %arg8: memref<16x64xf32, #tpu.memory_space<vmem>>) attributes {dimension_semantics = [#tpu.dimension_semantics<parallel>, #tpu.dimension_semantics<arbitrary>], iteration_bounds = array<i64: 1, 1>, scalar_prefetch = 0 : i64, scratch_operands = 1 : i64, tpu.core_type = #tpu.core_type<tc>, window_params = [{transform_indices = @transform_0, window_bounds = array<i64: 16, 64>}, {transform_indices = @transform_1, window_bounds = array<i64: 64, 128>}, {transform_indices = @transform_2, window_bounds = array<i64: 1, 128>}, {transform_indices = @transform_3, window_bounds = array<i64: 128, 64>}, {pipeline_mode = #tpu.pipeline_mode<synchronous>, transform_indices = @transform_4, window_bounds = array<i64: 1, 64>}, {transform_indices = @transform_5, window_bounds = array<i64: 16, 64>}]} {
    %c0_i32 = arith.constant 0 : i32
    %0 = arith.cmpi eq, %arg1, %c0_i32 : i32
    %1 = arith.extui %0 : i1 to i32
    %c0_i32_0 = arith.constant 0 : i32
    %2 = arith.cmpi ne, %1, %c0_i32_0 : i32
    scf.if %2 {
      %cst_30 = arith.constant 0.000000e+00 : f32
      %59 = vector.broadcast %cst_30 : f32 to vector<16x64xf32>
      %c0_31 = arith.constant 0 : index
      %c0_32 = arith.constant 0 : index
      %60 = vector.load %arg8[%c0_31, %c0_32] : memref<16x64xf32, #tpu.memory_space<vmem>>, vector<16x64xf32>
      tpu.vector_store %arg8[%c0_31, %c0_32], %59 {strides = array<i32>} : memref<16x64xf32, #tpu.memory_space<vmem>>, vector<16x64xf32>,
    } else {
    }
    %c0 = arith.constant 0 : index
    %c0_1 = arith.constant 0 : index
    %3 = vector.load %arg2[%c0, %c0_1] : memref<16x64xf32, #tpu.memory_space<vmem>>, vector<16x64xf32>
    %4 = arith.truncf %3 : vector<16x64xf32> to vector<16x64xbf16>
    %c0_2 = arith.constant 0 : index
    %c0_3 = arith.constant 0 : index
    %5 = vector.load %arg3[%c0_2, %c0_3] : memref<64x128xbf16, #tpu.memory_space<vmem>>, vector<64x128xbf16>
    %cst = arith.constant dense<0.000000e+00> : vector<16x128xf32>
    %6 = tpu.matmul %4, %5, %cst {dimension_numbers = #tpu.dot_dimension_numbers<[1], [0], [0], [1], [0, 0, 1, 1], [], []>} : vector<16x64xbf16>, vector<64x128xbf16>, vector<16x128xf32> -> vector<16x128xf32>
    %c0_4 = arith.constant 0 : index
    %c0_5 = arith.constant 0 : index
    %7 = vector.load %arg4[%c0_4, %c0_5] : memref<1x128xf32, #tpu.memory_space<vmem>>, vector<1x128xf32>
    %8 = vector.broadcast %7 : vector<1x128xf32> to vector<16x128xf32>
    %9 = arith.addf %6, %8 : vector<16x128xf32>
    %cst_6 = arith.constant 5.000000e-01 : f32
    %10 = vector.broadcast %cst_6 : f32 to vector<16x128xf32>
    %11 = arith.mulf %10, %9 : vector<16x128xf32>
    %cst_7 = arith.constant 0.707106769 : f32
    %12 = vector.broadcast %cst_7 : f32 to vector<16x128xf32>
    %13 = arith.mulf %9, %12 : vector<16x128xf32>
    %cst_8 = arith.constant 0.000000e+00 : f32
    %14 = vector.broadcast %cst_8 : f32 to vector<16x128xf32>
    %15 = arith.cmpf olt, %13, %14 : vector<16x128xf32>
    %cst_9 = arith.constant -1.000000e+00 : f32
    %cst_10 = arith.constant 1.000000e+00 : f32
    %16 = vector.broadcast %cst_9 : f32 to vector<16x128xf32>
    %17 = vector.broadcast %cst_10 : f32 to vector<16x128xf32>
    %18 = arith.select %15, %16, %17 : vector<16x128xi1>, vector<16x128xf32>
    %19 = math.absf %13 : vector<16x128xf32>
    %cst_11 = arith.constant 0.327591091 : f32
    %20 = vector.broadcast %cst_11 : f32 to vector<16x128xf32>
    %21 = arith.mulf %20, %19 : vector<16x128xf32>
    %cst_12 = arith.constant 1.000000e+00 : f32
    %22 = vector.broadcast %cst_12 : f32 to vector<16x128xf32>
    %23 = arith.addf %22, %21 : vector<16x128xf32>
    %24 = tpu.reciprocal %23 {approx = true} : vector<16x128xf32> -> vector<16x128xf32>
    %cst_13 = arith.constant 1.06140542 : f32
    %25 = vector.broadcast %cst_13 : f32 to vector<16x128xf32>
    %26 = arith.mulf %25, %24 : vector<16x128xf32>
    %cst_14 = arith.constant -1.45315206 : f32
    %27 = vector.broadcast %cst_14 : f32 to vector<16x128xf32>
    %28 = arith.addf %26, %27 : vector<16x128xf32>
    %29 = arith.mulf %28, %24 : vector<16x128xf32>
    %cst_15 = arith.constant 1.42141378 : f32
    %30 = vector.broadcast %cst_15 : f32 to vector<16x128xf32>
    %31 = arith.addf %29, %30 : vector<16x128xf32>
    %32 = arith.mulf %31, %24 : vector<16x128xf32>
    %cst_16 = arith.constant -0.284496725 : f32
    %33 = vector.broadcast %cst_16 : f32 to vector<16x128xf32>
    %34 = arith.addf %32, %33 : vector<16x128xf32>
    %35 = arith.mulf %34, %24 : vector<16x128xf32>
    %cst_17 = arith.constant 0.254829586 : f32
    %36 = vector.broadcast %cst_17 : f32 to vector<16x128xf32>
    %37 = arith.addf %35, %36 : vector<16x128xf32>
    %38 = arith.mulf %37, %24 : vector<16x128xf32>
    %cst_18 = arith.constant 0.000000e+00 : f32
    %39 = vector.broadcast %cst_18 : f32 to vector<16x128xf32>
    %40 = arith.subf %39, %19 : vector<16x128xf32>
    %41 = arith.mulf %40, %19 : vector<16x128xf32>
    %42 = math.exp %41 : vector<16x128xf32>
    %43 = arith.mulf %38, %42 : vector<16x128xf32>
    %cst_19 = arith.constant 1.000000e+00 : f32
    %44 = vector.broadcast %cst_19 : f32 to vector<16x128xf32>
    %45 = arith.subf %44, %43 : vector<16x128xf32>
    %46 = arith.mulf %18, %45 : vector<16x128xf32>
    %cst_20 = arith.constant 1.000000e+00 : f32
    %47 = vector.broadcast %cst_20 : f32 to vector<16x128xf32>
    %48 = arith.addf %47, %46 : vector<16x128xf32>
    %49 = arith.mulf %11, %48 : vector<16x128xf32>
    %c0_21 = arith.constant 0 : index
    %c0_22 = arith.constant 0 : index
    %50 = vector.load %arg8[%c0_21, %c0_22] : memref<16x64xf32, #tpu.memory_space<vmem>>, vector<16x64xf32>
    %51 = arith.truncf %49 : vector<16x128xf32> to vector<16x128xbf16>
    %c0_23 = arith.constant 0 : index
    %c0_24 = arith.constant 0 : index
    %52 = vector.load %arg5[%c0_23, %c0_24] : memref<128x64xbf16, #tpu.memory_space<vmem>>, vector<128x64xbf16>
    %cst_25 = arith.constant dense<0.000000e+00> : vector<16x64xf32>
    %53 = tpu.matmul %51, %52, %cst_25 {dimension_numbers = #tpu.dot_dimension_numbers<[1], [0], [0], [1], [0, 0, 1, 1], [], []>} : vector<16x128xbf16>, vector<128x64xbf16>, vector<16x64xf32> -> vector<16x64xf32>
    %54 = arith.addf %50, %53 : vector<16x64xf32>
    %c0_26 = arith.constant 0 : index
    %c0_27 = arith.constant 0 : index
    %55 = vector.load %arg8[%c0_26, %c0_27] : memref<16x64xf32, #tpu.memory_space<vmem>>, vector<16x64xf32>
    tpu.vector_store %arg8[%c0_26, %c0_27], %54 {strides = array<i32>} : memref<16x64xf32, #tpu.memory_space<vmem>>, vector<16x64xf32>,
    %c0_i32_28 = arith.constant 0 : i32
    %56 = arith.cmpi eq, %arg1, %c0_i32_28 : i32
    %57 = arith.extui %56 : i1 to i32
    %c0_i32_29 = arith.constant 0 : i32
    %58 = arith.cmpi ne, %57, %c0_i32_29 : i32
    scf.if %58 {
      %c0_30 = arith.constant 0 : index
      %c0_31 = arith.constant 0 : index
      %59 = vector.load %arg8[%c0_30, %c0_31] : memref<16x64xf32, #tpu.memory_space<vmem>>, vector<16x64xf32>
      %c0_32 = arith.constant 0 : index
      %c0_33 = arith.constant 0 : index
      %60 = vector.load %arg6[%c0_32, %c0_33] : memref<1x64xf32, #tpu.memory_space<vmem>>, vector<1x64xf32>
      %61 = vector.broadcast %60 : vector<1x64xf32> to vector<16x64xf32>
      %62 = arith.addf %59, %61 : vector<16x64xf32>
      %c0_34 = arith.constant 0 : index
      %c0_35 = arith.constant 0 : index
      %63 = vector.load %arg7[%c0_34, %c0_35] : memref<16x64xf32, #tpu.memory_space<vmem>>, vector<16x64xf32>
      tpu.vector_store %arg7[%c0_34, %c0_35], %62 {strides = array<i32>} : memref<16x64xf32, #tpu.memory_space<vmem>>, vector<16x64xf32>,
    } else {
    }
    return
  }
  func.func @transform_0(%arg0: i32, %arg1: i32) -> (i32, i32) {
    %c0_i32 = arith.constant 0 : i32
    %c0_i32_0 = arith.constant 0 : i32
    return %arg0, %c0_i32 : i32, i32
  }
  func.func @transform_1(%arg0: i32, %arg1: i32) -> (i32, i32) {
    %c0_i32 = arith.constant 0 : i32
    %c0_i32_0 = arith.constant 0 : i32
    return %c0_i32, %arg1 : i32, i32
  }
  func.func @transform_2(%arg0: i32, %arg1: i32) -> (i32, i32) {
    %c0_i32 = arith.constant 0 : i32
    %c0_i32_0 = arith.constant 0 : i32
    return %c0_i32, %arg1 : i32, i32
  }
  func.func @transform_3(%arg0: i32, %arg1: i32) -> (i32, i32) {
    %c0_i32 = arith.constant 0 : i32
    %c0_i32_0 = arith.constant 0 : i32
    return %arg1, %c0_i32 : i32, i32
  }
  func.func @transform_4(%arg0: i32, %arg1: i32) -> (i32, i32) {
    %c0_i32 = arith.constant 0 : i32
    %c0_i32_0 = arith.constant 0 : i32
    %c0_i32_1 = arith.constant 0 : i32
    return %c0_i32, %c0_i32_0 : i32, i32
  }
  func.func @transform_5(%arg0: i32, %arg1: i32) -> (i32, i32) {
    %c0_i32 = arith.constant 0 : i32
    %c0_i32_0 = arith.constant 0 : i32
    return %arg0, %c0_i32 : i32, i32
  }
}

</mosaic_0001>

<bundles_post_ra>
// kernel: feed_forward_jit.1
= control target key start
LH: loop header
LB: loop body
LE: loop exit
PB: predicated region body
PF: predicated region fallthrough
CT: control target
= control target key end

     0   :  { %s453_s0 = inlined_call_operand.vmem [shape: f32[16,64], index: 0, kind: input, shape index: {}]   ;;  %s454_s1 = inlined_call_operand.vmem [shape: bf16[64,128], index: 1, kind: input, shape index: {}]   ;;  %s455_s2 = inlined_call_operand.vmem [shape: f32[1,128], index: 2, kind: input, shape index: {}]   ;;  %s456_s3 = inlined_call_operand.vmem [shape: bf16[128,64], index: 3, kind: input, shape index: {}]   ;;  %s457_s4 = inlined_call_operand.vmem [shape: f32[1,64], index: 4, kind: input, shape index: {}]   ;;  %s458_s5 = inlined_call_operand.hbm [shape: f32[16,64], index: 5, kind: output, shape index: {}]  }
   0x1   :  { %v306_v0 = vld [vmem:[%s454_s1 + $0x18] sm:$0xff]  ;;  %v305_v1 = vld [vmem:[%s454_s1 + $0x10] sm:$0xff] }
   0x2   :  { %76 = vmatpush.bf16.msra.mxu0 %v306_v0 }
   0x3   :  { %10 = vsyncpa [#allocation4], 0  ;;  %v304_v2 = vld [vmem:[%s454_s1 + $0x8] sm:$0xff]  ;;  %v303_v3 = vld [vmem:[%s454_s1] sm:$0xff]  ;;  %vm26_vm0 = vcmask 523264   ;;  %v356_v38 = vmov 0.0  }
   0x4   :  { %v29_v4 = vld [vmem:[%s453_s0] sm:$0xff]  ;;  %v30_v5 = vld [vmem:[%s453_s0 + $0x8] sm:$0xff]  ;;  %v314_v7 = vld [vmem:[%s456_s3 + $0x38] sm:$0xff]  ;;  %27 = vst.msk [vmem:[#allocation2] sm:$0xff] %vm26_vm0, %v356_v38  ;;  %v357_v59 = vmov 1.0   ;;  %s358_s21 = smov [#allocation3]  }
   0x5   :  { %v31_v6 = vpack.c.bf16 %v30_v5, %v29_v4  ;;  %205 = vmatpush.bf16.msra.mxu1 %v314_v7  ;;  %v313_v8 = vld [vmem:[%s456_s3 + $0x30] sm:$0xff]  ;;  %v312_v9 = vld [vmem:[%s456_s3 + $0x28] sm:$0xff]  ;;  %v320_v10 = vld [vmem:[%s455_s2] ss:$0 sm:$0xff]  ;;  %28 = vst.msk [vmem:[#allocation2 + $0x8] sm:$0xff] %vm26_vm0, %v356_v38  ;;  %s240_s22 = sshll.u32 %s358_s21, 4  ;;  %s241_s22 = int_to_ptr.vmem [resolvable:$true] %s240_s22 }
   0x6   :  { %77 = vmatpush.bf16.msra.mxu0 %v305_v1  ;;  %v311_v11 = vld [vmem:[%s456_s3 + $0x20] sm:$0xff]  ;;  %v310_v15 = vld [vmem:[%s456_s3 + $0x18] sm:$0xff]  ;;  %v309_v18 = vld [vmem:[%s456_s3 + $0x10] sm:$0xff]  ;;  %s242_s25 = sshll.u32 %s458_s5, 4  ;;  %s360_s26 = smov 8   ;;  %s243_s25 = int_to_ptr.hbm [resolvable:$true] %s242_s25 }
   0x7   :  { %v308_v23 = vld [vmem:[%s456_s3 + $0x8] sm:$0xff]  ;;  %v307_v26 = vld [vmem:[%s456_s3] sm:$0xff] }
   0x9   :  { %206 = vmatpush.bf16.msra.mxu1 %v313_v8 }
   0xa   :  { %78 = vmatpush.bf16.msra.mxu0 %v304_v2 }
   0xd   :  { %207 = vmatpush.bf16.msra.mxu1 %v312_v9  ;;  %v138_v9 = vld [vmem:[#allocation2] sm:$0xff] }
   0xe   :  { %79 = vmatpush.bf16.msra.mxu0 %v303_v3 }
  0x11   :  { %270 = vmatmul.msk.bf16.vlgmr.msra.gmra.mxu0 %vm26_vm0, %v31_v6  ;;  %208 = vmatpush.bf16.msra.mxu1 %v311_v11 }
  0x15   :  { %209 = vmatpush.bf16.msra.mxu1 %v310_v15 }
  0x19   :  { %210 = vmatpush.bf16.msra.mxu1 %v309_v18 }
  0x1d   :  { %211 = vmatpush.bf16.msra.mxu1 %v308_v23 }
  0x21   :  { %212 = vmatpush.bf16.msra.mxu1 %v307_v26 }
  0x8e   :  { %v81_v12 = vpop.f32.mrf.mxu0 }
  0x8f   :  { %v425_v13 = vadd.f32 %v320_v10, %v81_v12  ;;  %v139_v12 = vld [vmem:[#allocation2 + $0x8] sm:$0xff] }
  0x91   :  { %v88_v14 = vmul.f32 0.70710677, %v425_v13  ;;  %v86_v3 = vmul.f32 0.5, %v425_v13 }
  0x93   :  { %v94_v16 = vand.u32 2147483647, %v88_v14  ;;  %vm90_vm1 = vcmp.lt.f32.partialorder %v88_v14, 0.0  ;;  %v321_v14 = vld [vmem:[%s457_s4] ss:$0 sm:$0xff]  ;;  %s359_s4 = smov 128  }
  0x94   :  { %v92_v60 = vsel %vm90_vm1, -1.0, %v357_v59 }
  0x95   :  { %v96_v17 = vmul.f32 0.3275911, %v94_v16  ;;  %v120_v28 = vsub.f32 0.0, %v94_v16 }
  0x96   :  { %v83_v19 = vpop.f32.mrf.mxu0 }
  0x97   :  { %v98_v20 = vadd.f32 1.0, %v96_v17  ;;  %v84_v21 = vadd.f32 %v320_v10, %v83_v19  ;;  %v122_v32 = vmul.f32 %v120_v28, %v94_v16 }
  0x99   :  { %322 = vrcp.f32 %v98_v20  ;;  %v89_v22 = vmul.f32 0.70710677, %v84_v21  ;;  %v124_v36 = vmul.f32 1.442695, %v122_v32  ;;  %v87_v4 = vmul.f32 0.5, %v84_v21 }
  0x9b   :  { %v95_v24 = vand.u32 2147483647, %v89_v22  ;;  %vm91_vm2 = vcmp.lt.f32.partialorder %v89_v22, 0.0 }
  0x9c   :  { %v93_v0 = vsel %vm91_vm2, -1.0, %v357_v59 }
  0x9d   :  { %v97_v25 = vmul.f32 0.3275911, %v95_v24  ;;  %v121_v37 = vsub.f32 0.0, %v95_v24 }
  0x9f   :  { %v323_v27 = vpop.eup %322  ;;  %v99_v29 = vadd.f32 1.0, %v97_v25  ;;  %v123_v43 = vmul.f32 %v121_v37, %v95_v24 }
  0xa0   :  { %v102_v30 = vmul.f32 1.0614054, %v323_v27 }
  0xa1   :  { %324 = vrcp.f32 %v99_v29  ;;  %v126_v48 = vmul.f32 1.442695, %v123_v43 }
  0xa2   :  { %v104_v31 = vadd.f32 -1.4531521, %v102_v30  ;;  %326 = vpow2.f32 %v124_v36 }
  0xa3   :  { %328 = vpow2.f32 %v126_v48 }
  0xa4   :  { %v106_v33 = vmul.f32 %v323_v27, %v104_v31 }
  0xa6   :  { %v108_v34 = vadd.f32 1.4214138, %v106_v33 }
  0xa7   :  { %v325_v35 = vpop.eup %324 }
  0xa8   :  { %v103_v39 = vmul.f32 1.0614054, %v325_v35  ;;  %v110_v40 = vmul.f32 %v323_v27, %v108_v34  ;;  %v327_v51 = vpop.eup %326 }
  0xa9   :  { %v329_v58 = vpop.eup %328 }
  0xaa   :  { %v105_v41 = vadd.f32 -1.4531521, %v103_v39  ;;  %v112_v42 = vadd.f32 -0.28449672, %v110_v40 }
  0xac   :  { %v107_v44 = vmul.f32 %v325_v35, %v105_v41  ;;  %v114_v45 = vmul.f32 %v323_v27, %v112_v42 }
  0xae   :  { %v109_v46 = vadd.f32 1.4214138, %v107_v44  ;;  %v116_v47 = vadd.f32 0.2548296, %v114_v45 }
  0xb0   :  { %v111_v49 = vmul.f32 %v325_v35, %v109_v46  ;;  %v118_v50 = vmul.f32 %v323_v27, %v116_v47 }
  0xb2   :  { %v113_v52 = vadd.f32 -0.28449672, %v111_v49  ;;  %v128_v53 = vmul.f32 %v327_v51, %v118_v50 }
  0xb4   :  { %v115_v54 = vmul.f32 %v325_v35, %v113_v52  ;;  %v130_v56 = vsub.f32 1.0, %v128_v53 }
  0xb6   :  { %v117_v55 = vadd.f32 0.2548296, %v115_v54  ;;  %v132_v62 = vmul.f32 %v130_v56, %v92_v60 }
  0xb8   :  { %v119_v57 = vmul.f32 %v325_v35, %v117_v55  ;;  %v134_v2 = vadd.f32 1.0, %v132_v62 }
  0xba   :  { %v129_v61 = vmul.f32 %v329_v58, %v119_v57  ;;  %v136_v6 = vmul.f32 %v134_v2, %v86_v3 }
  0xbc   :  { %v131_v63 = vsub.f32 1.0, %v129_v61 }
  0xbe   :  { %v133_v1 = vmul.f32 %v131_v63, %v93_v0 }
  0xc0   :  { %v135_v5 = vadd.f32 1.0, %v133_v1 }
  0xc2   :  { %v137_v7 = vmul.f32 %v135_v5, %v87_v4 }
  0xc4   :  { %v140_v8 = vpack.c.bf16 %v137_v7, %v136_v6 }
  0xc6   :  { %213 = vmatmul.bf16.vlgmr.msra.gmra.mxu1 %v140_v8 }
 0x143   :  { %v214_v10 = vpop.f32.mrf.mxu1 }
 0x144   :  { %v219_v11 = vadd.f32 %v214_v10, %v138_v9 }
 0x146   :  { %221 = vst.msk [vmem:[#allocation2] sm:$0xff] %vm26_vm0, %v219_v11 }
 0x14b   :  { %v216_v15 = vpop.f32.mrf.mxu1 }
 0x14c   :  { %v220_v16 = vadd.f32 %v216_v15, %v139_v12 }
 0x14d   :  { %v226_v17 = vld [vmem:[#allocation2] sm:$0xff] }
 0x14e   :  { %222 = vst.msk [vmem:[#allocation2 + $0x8] sm:$0xff] %vm26_vm0, %v220_v16  ;;  %v232_v13 = vadd.f32 %v321_v14, %v226_v17 }
 0x150   :  { %234 = vst.msk [vmem:[#allocation3] sm:$0xff] %vm26_vm0, %v232_v13 }
 0x155   :  { %v227_v18 = vld [vmem:[#allocation2 + $0x8] sm:$0xff] }
 0x156   :  { %v233_v19 = vadd.f32 %v321_v14, %v227_v18 }
 0x158   :  { %235 = vst.msk [vmem:[#allocation3 + $0x8] sm:$0xff] %vm26_vm0, %v233_v19 }
 0x159   :  { %248 = dma.vmem_to_hbm [thread:$0]  %s241_s22, 256, %s243_s25, [#allocation4], %s359_s4, %s359_s4, %s360_s26  }
 0x15a   :  { %354 = dma.done.wait [#allocation4], 256  }
 0x15b   :  { %355 = vsyncadd [#allocation4], 4294967040 }
 0x15c   :  { %253 = vsyncpa [#allocation4], 1 }

</bundles_post_ra>
